<compile_context>
chip_gen: v7x
topology: tpu7x:2x2x1
jax: 0.10.0
libtpu: 0.0.40
codegen_flags: <defaults>
</compile_context>

<pallas_src>
import functools

import jax
import jax.numpy as jnp
from jax.experimental import pallas as pl
from jax.experimental.pallas import tpu as pltpu

LANES = 128
TARGET_TILE_ROWS = 2048   # 2048 * 128 * 4 B = 1 MiB per input block
NUM_SHARDS = 2            # parallel axis -> both TCs on v7x; harmless on 1-TC chips


def _charbonnier_kernel(x_ref, y_ref, out_ref, *, eps, n, tile_rows,
                        tiles_per_shard):
    s = pl.program_id(0)          # parallel shard axis (TensorCore split)
    t = pl.program_id(1)          # reduction axis

    @pl.when(t == 0)
    def _():
        out_ref[...] = jnp.zeros_like(out_ref)

    d = x_ref[...].astype(jnp.float32) - y_ref[...].astype(jnp.float32)
    val = jnp.sqrt(d * d + jnp.float32(eps * eps))

    # Mask out elements past the true element count (tail tile / OOB rows of
    # edge blocks).  n is assumed to fit in int32.
    row_start = (s * tiles_per_shard + t) * tile_rows
    row_ids = jax.lax.broadcasted_iota(jnp.int32, (tile_rows, LANES), 0)
    lane_ids = jax.lax.broadcasted_iota(jnp.int32, (tile_rows, LANES), 1)
    elem_ids = (row_start + row_ids) * LANES + lane_ids
    val = jnp.where(elem_ids < n, val, 0.0)

    # Cheap VPU partial reduce: collapse the block to a single (8, 128) vreg
    # and accumulate into the resident output block (same block for all t).
    partial = jnp.sum(val.reshape(tile_rows // 8, 8, LANES), axis=0)
    out_ref[...] += partial[None]


def charbonnier_loss(x, y, eps=1e-3):
    assert x.shape == y.shape
    n = x.size

    xf = jnp.ravel(x)
    yf = jnp.ravel(y)

    rows = pl.cdiv(n, LANES)
    if rows * LANES != n:
        # Rare fallback: only when n is not a multiple of 128.  Padded
        # elements are masked away inside the kernel anyway.
        pad = rows * LANES - n
        xf = jnp.pad(xf, (0, pad))
        yf = jnp.pad(yf, (0, pad))
    xf = xf.reshape(rows, LANES)
    yf = yf.reshape(rows, LANES)

    # Shard rows across NUM_SHARDS (parallel axis), then tile each shard's
    # rows along the trailing 'arbitrary' reduction axis.
    rows_per_shard = pl.cdiv(rows, NUM_SHARDS)
    tile_rows = min(TARGET_TILE_ROWS, ((rows_per_shard + 7) // 8) * 8)
    tiles_per_shard = pl.cdiv(rows_per_shard, tile_rows)

    grid = (NUM_SHARDS, tiles_per_shard)

    def in_map(s, t):
        return (s * tiles_per_shard + t, 0)

    partials = pl.pallas_call(
        functools.partial(
            _charbonnier_kernel, eps=eps, n=n, tile_rows=tile_rows,
            tiles_per_shard=tiles_per_shard),
        out_shape=jax.ShapeDtypeStruct((NUM_SHARDS, 8, LANES), jnp.float32),
        grid_spec=pltpu.PrefetchScalarGridSpec(
            num_scalar_prefetch=0,
            grid=grid,
            in_specs=[
                pl.BlockSpec((tile_rows, LANES), in_map),
                pl.BlockSpec((tile_rows, LANES), in_map),
            ],
            out_specs=pl.BlockSpec((1, 8, LANES), lambda s, t: (s, 0, 0)),
        ),
        compiler_params=pltpu.CompilerParams(
            dimension_semantics=("parallel", "arbitrary"),
        ),
    )(xf, yf)

    # Single cheap cross-lane reduce over the tiny per-shard vreg partials.
    return jnp.sum(partials) / jnp.float32(n)


if __name__ == "__main__":
    key = jax.random.PRNGKey(0)
    kx, ky = jax.random.split(key)
    # Small NCHW shapes consistent with an image-restoration loss.
    x = jax.random.normal(kx, (2, 4, 16, 16), dtype=jnp.float32)
    y = jax.random.normal(ky, (2, 4, 16, 16), dtype=jnp.float32)

    loss = charbonnier_loss(x, y, eps=1e-3)
    loss = jax.block_until_ready(loss)

    # Reference check in plain JAX.
    d = x - y
    ref = jnp.mean(jnp.sqrt(d * d + 1e-3 * 1e-3))
    assert jnp.allclose(loss, ref, rtol=1e-5, atol=1e-6), (loss, ref)

    print("KERNEL_OK")
</pallas_src>

<mosaic_0001>
module attributes {stable_mosaic.version = 11 : i64} {
  func.func @_charbonnier_kernel(%arg0: i32, %arg1: i32, %arg2: memref<8x128xf32, #tpu.memory_space<vmem>>, %arg3: memref<8x128xf32, #tpu.memory_space<vmem>>, %arg4: memref<1x8x128xf32, #tpu.memory_space<vmem>>) attributes {dimension_semantics = [#tpu.dimension_semantics<parallel>, #tpu.dimension_semantics<arbitrary>], iteration_bounds = array<i64: 2, 1>, scalar_prefetch = 0 : i64, scratch_operands = 0 : i64, tpu.core_type = #tpu.core_type<tc>, window_params = [{transform_indices = @transform_0, window_bounds = array<i64: 8, 128>}, {transform_indices = @transform_1, window_bounds = array<i64: 8, 128>}, {transform_indices = @transform_2, window_bounds = array<i64: 1, 8, 128>}]} {
    %c0_i32 = arith.constant 0 : i32
    %0 = arith.cmpi eq, %arg1, %c0_i32 : i32
    %1 = arith.extui %0 : i1 to i32
    %c0_i32_0 = arith.constant 0 : i32
    %2 = arith.cmpi ne, %1, %c0_i32_0 : i32
    scf.if %2 {
      %cst_12 = arith.constant 0.000000e+00 : f32
      %30 = vector.broadcast %cst_12 : f32 to vector<1x8x128xf32>
      %c0_13 = arith.constant 0 : index
      %c0_14 = arith.constant 0 : index
      %c0_15 = arith.constant 0 : index
      %31 = vector.load %arg4[%c0_13, %c0_14, %c0_15] : memref<1x8x128xf32, #tpu.memory_space<vmem>>, vector<1x8x128xf32>
      tpu.vector_store %arg4[%c0_13, %c0_14, %c0_15], %30 {strides = array<i32>} : memref<1x8x128xf32, #tpu.memory_space<vmem>>, vector<1x8x128xf32>,
    } else {
    }
    %c0 = arith.constant 0 : index
    %c0_1 = arith.constant 0 : index
    %3 = vector.load %arg2[%c0, %c0_1] : memref<8x128xf32, #tpu.memory_space<vmem>>, vector<8x128xf32>
    %c0_2 = arith.constant 0 : index
    %c0_3 = arith.constant 0 : index
    %4 = vector.load %arg3[%c0_2, %c0_3] : memref<8x128xf32, #tpu.memory_space<vmem>>, vector<8x128xf32>
    %5 = arith.subf %3, %4 : vector<8x128xf32>
    %6 = arith.mulf %5, %5 : vector<8x128xf32>
    %cst = arith.constant 9.99999997E-7 : f32
    %7 = vector.broadcast %cst : f32 to vector<8x128xf32>
    %8 = arith.addf %6, %7 : vector<8x128xf32>
    %9 = math.sqrt %8 : vector<8x128xf32>
    %c1_i32 = arith.constant 1 : i32
    %10 = arith.muli %arg0, %c1_i32 : i32
    %11 = arith.addi %10, %arg1 : i32
    %c8_i32 = arith.constant 8 : i32
    %12 = arith.muli %11, %c8_i32 : i32
    %13 = tpu.iota {dimensions = array<i32: 0>} : vector<8x128xi32>
    %14 = tpu.iota {dimensions = array<i32: 1>} : vector<8x128xi32>
    %15 = vector.broadcast %12 : i32 to vector<8x128xi32>
    %16 = arith.addi %15, %13 : vector<8x128xi32>
    %c128_i32 = arith.constant 128 : i32
    %17 = vector.broadcast %c128_i32 : i32 to vector<8x128xi32>
    %18 = arith.muli %16, %17 : vector<8x128xi32>
    %19 = arith.addi %18, %14 : vector<8x128xi32>
    %c2048_i32 = arith.constant 2048 : i32
    %20 = vector.broadcast %c2048_i32 : i32 to vector<8x128xi32>
    %21 = arith.cmpi slt, %19, %20 : vector<8x128xi32>
    %cst_4 = arith.constant 0.000000e+00 : f32
    %22 = vector.broadcast %cst_4 : f32 to vector<8x128xf32>
    %23 = arith.select %21, %9, %22 : vector<8x128xi1>, vector<8x128xf32>
    %24 = vector.shape_cast %23 : vector<8x128xf32> to vector<1x8x128xf32>
    %cst_5 = arith.constant dense<0.000000e+00> : vector<8x128xf32>
    %25 = vector.multi_reduction <add>, %24, %cst_5 [0] : vector<1x8x128xf32> to vector<8x128xf32>
    %c0_6 = arith.constant 0 : index
    %c0_7 = arith.constant 0 : index
    %c0_8 = arith.constant 0 : index
    %26 = vector.load %arg4[%c0_6, %c0_7, %c0_8] : memref<1x8x128xf32, #tpu.memory_space<vmem>>, vector<1x8x128xf32>
    %27 = vector.shape_cast %25 : vector<8x128xf32> to vector<1x8x128xf32>
    %28 = arith.addf %26, %27 : vector<1x8x128xf32>
    %c0_9 = arith.constant 0 : index
    %c0_10 = arith.constant 0 : index
    %c0_11 = arith.constant 0 : index
    %29 = vector.load %arg4[%c0_9, %c0_10, %c0_11] : memref<1x8x128xf32, #tpu.memory_space<vmem>>, vector<1x8x128xf32>
    tpu.vector_store %arg4[%c0_9, %c0_10, %c0_11], %28 {strides = array<i32>} : memref<1x8x128xf32, #tpu.memory_space<vmem>>, vector<1x8x128xf32>,
    return
  }
  func.func @transform_0(%arg0: i32, %arg1: i32) -> (i32, i32) {
    %c1_i32 = arith.constant 1 : i32
    %0 = arith.muli %arg0, %c1_i32 : i32
    %1 = arith.addi %0, %arg1 : i32
    %c0_i32 = arith.constant 0 : i32
    %c0_i32_0 = arith.constant 0 : i32
    return %1, %c0_i32 : i32, i32
  }
  func.func @transform_1(%arg0: i32, %arg1: i32) -> (i32, i32) {
    %c1_i32 = arith.constant 1 : i32
    %0 = arith.muli %arg0, %c1_i32 : i32
    %1 = arith.addi %0, %arg1 : i32
    %c0_i32 = arith.constant 0 : i32
    %c0_i32_0 = arith.constant 0 : i32
    return %1, %c0_i32 : i32, i32
  }
  func.func @transform_2(%arg0: i32, %arg1: i32) -> (i32, i32, i32) {
    %c0_i32 = arith.constant 0 : i32
    %c0_i32_0 = arith.constant 0 : i32
    %c0_i32_1 = arith.constant 0 : i32
    return %arg0, %c0_i32, %c0_i32_0 : i32, i32, i32
  }
}

</mosaic_0001>

<bundles_post_ra>
// kernel: tpu_custom_call.1
= control target key start
LH: loop header
LB: loop body
LE: loop exit
PB: predicated region body
PF: predicated region fallthrough
CT: control target
= control target key end

     0   :  { %7 = vsyncpa [#allocation3], 0  ;;  %s845_s0 = inlined_call_operand.hbm [shape: f32[16,128], index: 0, kind: input, shape index: {}]   ;;  %s846_s1 = inlined_call_operand.hbm [shape: f32[16,128], index: 1, kind: input, shape index: {}]   ;;  %s847_s2 = inlined_call_operand.hbm [shape: f32[2,8,128], index: 2, kind: output, shape index: {}]  }
   0x1   :  { %9 = vsyncpa [#allocation3 + $0x1], 0 }
   0x2   :  { %10 = vsyncpa [#allocation6], 0 }
   0x3   :  { %12 = vsyncpa [#allocation6 + $0x1], 0 }
   0x4   :  { %13 = vsyncpa [#allocation4], 0 }
   0x5   :  { %15 = vsyncpa [#allocation4 + $0x1], 0  ;;  %s619_s9 = smov 0   ;;  %s621_s10 = smov 0  }
   0x6   :  { %s623_s11 = smov 0   ;;  %s625_s12 = smov 0  }
   0x7   :  { %s627_s13 = smov 0   ;;  %s629_s14 = smov 0  }
   0x8 LB: > { %s366_s15 = sadd.s32 4294967295, %s599_s14   ;;  %s367_s16 = sadd.s32 4294967294, %s599_s14   ;;  %s599_s14 = sphi %s629_s14, %s21_s14   ;;  %s595_s13 = sphi %s627_s13, %s867_s13   ;;  %s591_s12 = sphi %s625_s12, %s866_s12   ;;  %s587_s11 = sphi %s623_s11, %s865_s11   ;;  %s583_s10 = sphi %s621_s10, %s864_s10   ;;  %s579_s9 = sphi %s619_s9, %s863_s9  }
   0x9   : > { %s33_s17 = sadd.s32 1, %s595_s13  ;;  %s42_s18 = sadd.s32 1, %s587_s11 }
   0xa   : > { %p35_p0 = scmp.ge.s32.totalorder %s33_s17, 2  ;;  %p49_p1 = scmp.ne.s32.totalorder %s587_s11, %s583_s10 }
   0xb   : > { %p50_p2 = scmp.eq.s32.totalorder %s599_s14, 0  ;;  %p55_p3 = scmp.ne.s32.totalorder %s583_s10, %s579_s9 }
   0xc   : > { %s869_s17 = smov (%p35_p0, %s33_s17), 0  ;;  %p56_p5 = scmp.eq.s32.totalorder %s366_s15, 0 }
   0xd   : > { %p660_p4 = por %p50_p2, %p49_p1  ;;  %s39_s20 = ssub.s32 %s595_s13, %s869_s17 }
   0xe   : > { %p107_p6 = scmp.eq.s32.totalorder %s366_s15, 1  ;;  %p40_p7 = scmp.eq.s32.totalorder %s39_s20, 0 }
   0xf   : > { %p666_p8 = por %p56_p5, %p55_p3  ;;  %p113_p10 = scmp.eq.s32.totalorder %s367_s16, 1 }
  0x10   : > { %p670_p9 = por %p107_p6, %p49_p1  ;;  %p400_p13 = scmp.lt.s32.totalorder %s599_s14, 2 }
  0x11   : > { %s851_s21 = scalar_select %p666_p8, 1, 0 }
  0x12   : > { %s852_s22 = scalar_select %p670_p9, 1, 0 }
  0x13   : > { %s675_s23 = scalar_select %p40_p7, %s587_s11, %s42_s18  }
  0x14   : > { %p677_p11 = por %p113_p10, %p55_p3  ;;  %s684_s25 = sand.u32 1, %s587_s11  }
  0x15   : > { %s370_s26 = sshll.u32 %s684_s25, 3  ;;  %s371_s27 = sshll.u32 %s595_s13, 7 }
  0x16   : > { %s853_s24 = scalar_select %p677_p11, 1, 0 }
  0x17   : > { %s693_s30 = scalar_lea.hbm %s845_s0, %s371_s27  ;;  %s137_s3 = scalar_lea.vmem [#allocation2], %s370_s26 }
  0x18   : > { %s145_s4 = sshll.u32 %s137_s3, 4  ;;  %p701_p0 = pnand %p400_p13, %p660_p4  ;;  %s697_s4 = int_to_ptr.vmem [resolvable:$true] %s145_s4 }
  0x19   : > { %s134_s6 = scalar_lea.sflag [#allocation3], %s684_s25  ;;  %s453_s7 = scalar_lea.hbm %s693_s30, 128 }
  0x1a   : > { %p454_p3 = scmp.ne.s32.totalorder %s693_s30, %s453_s7  ;;  %p455_p5 = pneg %p701_p0 }
  0x1b   : > { %s458_s16 = scalar_lea.hbm %s845_s0, 256  ;;  %p459_p4 = scmp.lt.u32.totalorder %s693_s30, %s845_s0 }
  0x1c   : > { %p456_p6 = pnand %p455_p5, %p454_p3  ;;  %p460_p10 = scmp.lt.u32.totalorder %s458_s16, %s453_s7 }
  0x1d   : > { %p462_p12 = scmp.lt.u32.totalorder %s453_s7, %s693_s30 }
  0x1e   : > { %p457_p7 = pneg %p456_p6  ;;  %p461_p13 = por %p460_p10, %p459_p4 }
  0x20   : > { %p463_p1 = por %p462_p12, %p461_p13 }
  0x22   : > { %p464_p2 = pnand %p463_p1, %p457_p7 }
  0x24   : > { %467 = shalt.err (!%p464_p2)
}
  0x25   : > { %s468_s20 = scalar_lea.vmem %s697_s4, 128  ;;  %s601_s28 = smov [#allocation2]  }
  0x26   : > { %p469_p3 = scmp.ne.s32.totalorder %s697_s4, %s468_s20  ;;  %s473_s29 = sshll.u32 %s601_s28, 4  ;;  %s474_s29 = int_to_ptr.vmem [resolvable:$false] %s473_s29 }
  0x27   : > { %s475_s3 = scalar_lea.vmem %s474_s29, 256  ;;  %p476_p9 = scmp.lt.s32.totalorder %s697_s4, %s474_s29 }
  0x28   : > { %p471_p6 = pnand %p469_p3, %p455_p5  ;;  %p477_p4 = scmp.lt.s32.totalorder %s475_s3, %s468_s20 }
  0x2a   : > { %p472_p11 = pneg %p471_p6  ;;  %p478_p10 = por %p477_p4, %p476_p9 }
  0x2c   : > { %p479_p12 = pnand %p478_p10, %p472_p11 }
  0x2e   : > { %482 = shalt.err (!%p479_p12)
}
  0x2f   : > { %392 = dma.hbm_to_vmem [thread:$0]  (!%p701_p0), %s693_s30, 128, %s697_s4, %s134_s6  }
  0x30   : > { %p855_p1 = scmp.lt.s32.totalorder %s599_s14, 3  ;;  %p856_p2 = scmp.ge.s32.totalorder %s599_s14, 1 }
  0x31   : > { %s746_s16 = scalar_lea.hbm %s846_s1, %s371_s27  ;;  %s156_s18 = scalar_lea.vmem [#allocation5], %s370_s26 }
  0x32   : > { %p737_p7 = pnand %p856_p2, %p855_p1  ;;  %s164_s19 = sshll.u32 %s156_s18, 4  ;;  %s165_s19 = int_to_ptr.vmem [resolvable:$true] %s164_s19 }
  0x33   : > { %s153_s30 = scalar_lea.sflag [#allocation6], %s684_s25  ;;  %s483_s4 = scalar_lea.hbm %s746_s16, 128 }
  0x34   : > { %s857_s7 = scalar_select %p737_p7, 1, 0 }
  0x35   : > { %p484_p9 = scmp.ne.s32.totalorder %s746_s16, %s483_s4  ;;  %s488_s27 = scalar_lea.hbm %s846_s1, 256 }
  0x36   : > { %p489_p3 = scmp.lt.u32.totalorder %s746_s16, %s846_s1  ;;  %p490_p6 = scmp.lt.u32.totalorder %s488_s27, %s483_s4 }
  0x37   : > { %p486_p11 = pnand %p484_p9, %p455_p5  ;;  %p492_p10 = scmp.lt.u32.totalorder %s483_s4, %s746_s16 }
  0x38   : > { %p491_p4 = por %p490_p6, %p489_p3 }
  0x39   : > { %p487_p13 = pneg %p486_p11 }
  0x3a   : > { %p493_p12 = por %p492_p10, %p491_p4 }
  0x3c   : > { %p494_p1 = pnand %p493_p12, %p487_p13 }
  0x3e   : > { %497 = shalt.err (!%p494_p1)
}
  0x3f   : > { %s498_s25 = scalar_lea.vmem %s165_s19, 128  ;;  %s602_s26 = smov [#allocation5]  }
  0x40   : > { %p499_p2 = scmp.ne.s32.totalorder %s165_s19, %s498_s25  ;;  %s503_s3 = sshll.u32 %s602_s26, 4  ;;  %s504_s3 = int_to_ptr.vmem [resolvable:$false] %s503_s3 }
  0x41   : > { %s505_s8 = scalar_lea.vmem %s504_s3, 256  ;;  %p506_p8 = scmp.lt.s32.totalorder %s165_s19, %s504_s3 }
  0x42   : > { %p501_p9 = pnand %p499_p2, %p455_p5  ;;  %p507_p7 = scmp.lt.s32.totalorder %s505_s8, %s498_s25 }
  0x44   : > { %p502_p11 = pneg %p501_p9  ;;  %p508_p3 = por %p507_p7, %p506_p8 }
  0x46   : > { %p509_p6 = pnand %p508_p3, %p502_p11 }
  0x48   : > { %512 = shalt.err (!%p509_p6)
}
  0x49   : > { %395 = dma.hbm_to_vmem [thread:$0]  (!%p701_p0), %s746_s16, 128, %s165_s19, %s153_s30  }
  0x4a   : > { %p858_p13 = scmp.ne.s32.totalorder %s857_s7, 0 }
  0x4b   : > { %s773_s15 = sand.u32 (!%p858_p13), 1, %s583_s10   ;;  %p859_p8 = scmp.ne.s32.totalorder (!%p858_p13), %s851_s21, 0 }
  0x4c   : > { %173 = sbr.rel (%p858_p13) target bundleno = 123 (0x7b), region = 28  ;;  %s776_s18 = sshll.u32 (!%p858_p13), %s773_s15, 3 }
  0x4d   : > { %s176_s4 = scalar_lea.sflag (!%p858_p13), [#allocation3], %s773_s15  ;;  %s179_s6 = scalar_lea.vmem (!%p858_p13), [#allocation2], %s776_s18 }
  0x53   : > { %566 = dma.done.wait (%p859_p8), %s176_s4, 128  }
  0x54   : > { %568 = vsyncadd (%p859_p8), %s176_s4, 4294967168  ;;  %s185_s5 = scalar_lea.sflag [#allocation6], %s773_s15  ;;  %s188_s7 = scalar_lea.vmem [#allocation5], %s776_s18 }
  0x55   : > { %570 = dma.done.wait (%p859_p8), %s185_s5, 128  }
  0x56   : > { %572 = vsyncadd (%p859_p8), %s185_s5, 4294967168  ;;  %v235_v0 = vlaneseq  ;;  %v221_v1 = vld [vmem:[%s179_s6] sm:$0xff]  ;;  %v222_v2 = vld [vmem:[%s188_s7] sm:$0xff]  ;;  %s378_s16 = sshll.u32 %s591_s12, 3  ;;  %s380_s21 = sshll.u32 %s591_s12, 7 }
  0x57   : > { %v223_v3 = vsub.f32 %v221_v1, %v222_v2  ;;  %v239_v6 = vstv %s378_s16  ;;  %s213_s19 = scalar_lea.vmem [#allocation7], %s776_s18  ;;  %s796_s28 = scalar_lea.hbm %s847_s2, %s380_s21 }
  0x58   : > { %v236_v5 = vshrl.u32 %v235_v0, 7  ;;  %v238_v9 = vand.u32 127, %v235_v0  ;;  %s263_s30 = sshll.u32 %s213_s19, 4  ;;  %s250_s29 = scalar_lea.sflag [#allocation4], %s773_s15  ;;  %s798_s30 = int_to_ptr.vmem [resolvable:$true] %s263_s30 }
  0x59   : > { %v224_v4 = vmul.f32 %v223_v3, %v223_v3  ;;  %s513_s25 = scalar_lea.vmem %s798_s30, 128  ;;  %p860_p5 = scmp.ne.s32.totalorder %s852_s22, 0 }
  0x5a   : > { %v240_v8 = vadd.s32 %v239_v6, %v236_v5  ;;  %p514_p0 = scmp.ne.s32.totalorder %s798_s30, %s513_s25  ;;  %s603_s12 = smov [#allocation7]  }
  0x5b   : > { %v225_v7 = vadd.f32 1e-06, %v224_v4  ;;  %s517_s26 = sshll.u32 %s603_s12, 4  ;;  %s518_s26 = int_to_ptr.vmem [resolvable:$false] %s517_s26 }
  0x5c   : > { %v241_v10 = vmul.u32 128, %v240_v8  ;;  %p515_p7 = pnand %p514_p0, %p860_p5  ;;  %s519_s3 = scalar_lea.vmem %s518_s26, 256 }
  0x5d   : > { %451 = vrsqrt.f32 %v225_v7  ;;  %vm228_vm0 = vcmp.eq.f32.partialorder %v225_v7, inf  ;;  %v231_v13 = vand.u32 2147483648, %v225_v7  ;;  %vm230_vm1 = vcmp.eq.f32.partialorder %v225_v7, 0.0  ;;  %p520_p10 = scmp.lt.s32.totalorder %s798_s30, %s518_s26  ;;  %p521_p12 = scmp.lt.s32.totalorder %s519_s3, %s513_s25 }
  0x5e   : > { %v242_v11 = vadd.s32 %v241_v10, %v238_v9  ;;  %p516_p4 = pneg %p515_p7 }
  0x5f   : > { %p522_p1 = por %p521_p12, %p520_p10 }
  0x60   : > { %vm243_vm2 = vcmp.lt.s32.totalorder %v242_v11, 2048 }
  0x61   : > { %p523_p2 = pnand %p522_p1, %p516_p4 }
  0x67   : > { %v452_v12 = vpop.eup %451 }
  0x68   : > { %v227_v14 = vmul.f32 %v452_v12, %v225_v7 }
  0x6a   : > { %v229_v15 = vsel %vm228_vm0, %v225_v7, %v227_v14 }
  0x6b   : > { %v232_v16 = vsel %vm230_vm1, %v231_v13, %v229_v15 }
  0x6c   : > { %v244_v17 = vsel %vm243_vm2, %v232_v16, 0.0 }
  0x6d   : > { %248 = vst [vmem:[%s213_s19] sm:$0xff] %v244_v17 }
  0x6e   : > { %526 = shalt.err (!%p523_p2)
}
  0x6f   : > { %s527_s8 = scalar_lea.hbm %s796_s28, 128  ;;  %s531_s4 = scalar_lea.hbm %s847_s2, 256 }
  0x70   : > { %p528_p9 = scmp.ne.s32.totalorder %s796_s28, %s527_s8  ;;  %p532_p6 = scmp.lt.u32.totalorder %s796_s28, %s847_s2 }
  0x71   : > { %p533_p13 = scmp.lt.u32.totalorder %s531_s4, %s527_s8  ;;  %p535_p0 = scmp.lt.u32.totalorder %s527_s8, %s796_s28 }
  0x72   : > { %p529_p11 = pnand %p528_p9, %p860_p5 }
  0x73   : > { %p534_p8 = por %p533_p13, %p532_p6 }
  0x74   : > { %p530_p3 = pneg %p529_p11 }
  0x75   : > { %p536_p7 = por %p535_p0, %p534_p8 }
  0x77   : > { %p537_p4 = pnand %p536_p7, %p530_p3 }
  0x79   : > { %540 = shalt.err (!%p537_p4)
}
  0x7a   : > { %387 = dma.vmem_to_hbm [thread:$0]  (%p860_p5), %s798_s30, 128, %s796_s28, %s250_s29  }
  0x7b PF: > { %s275_s7 = sand.u32 1, %s579_s9   ;;  %p861_p10 = scmp.ne.s32.totalorder %s853_s24, 0 }
  0x7c   : > { %p862_p12 = scmp.ge.s32.totalorder %s599_s14, 2  ;;  %s276_s16 = scalar_lea.sflag [#allocation4], %s275_s7 }
  0x7e   : > { %p397_p1 = pnand %p862_p12, %p861_p10 }
  0x80   : > { %574 = dma.done.wait (!%p397_p1), %s276_s16, 128  }
  0x81   : > { %576 = vsyncadd (!%p397_p1), %s276_s16, 4294967168  ;;  %s21_s14 = sadd.s32 1, %s599_s14   ;;  %s863_s9 = smov %s583_s10 }
  0x82   : > { %p18_p2 = scmp.ge.s32.totalorder %s21_s14, 4   ;;  %s864_s10 = smov %s587_s11 }
  0x83   : > { %s865_s11 = smov %s675_s23  ;;  %s866_s12 = smov %s595_s13 }
  0x84   : > { %s867_s13 = smov %s869_s17  ;;  %20 = sbr.rel (!%p18_p2) target bundleno = 8 (0x8), region = 90 }
  0x8b   :  { %281 = vsyncpa [#allocation3], 1 }
  0x8c   :  { %283 = vsyncpa [#allocation3 + $0x1], 1 }
  0x8d   :  { %284 = vsyncpa [#allocation6], 1 }
  0x8e   :  { %286 = vsyncpa [#allocation6 + $0x1], 1 }
  0x8f   :  { %287 = vsyncpa [#allocation4], 1 }
  0x90   :  { %289 = vsyncpa [#allocation4 + $0x1], 1 }

</bundles_post_ra>
